<compile_context>
chip_gen: v6e
topology: v6e:2x2x1
jax: 0.10.0
libtpu: 0.0.40
codegen_flags: <defaults>
</compile_context>

<pallas_src>
import jax
import jax.numpy as jnp
from jax.experimental import pallas as pl
from jax.experimental.pallas import tpu as pltpu


def _concat_kernel(x_ref, yt_ref, cat_ref):
    """Fused concat: build the (1, N+M) row in-register, store it once."""
    cat_ref[...] = jnp.concatenate(
        [x_ref[...].astype(cat_ref.dtype), yt_ref[...].astype(cat_ref.dtype)],
        axis=-1,
    )


def conditional_constructor_forward(x, yt, t, weight=None, bias=None,
                                    keep_lane_dense=False):
    """Pallas equivalent of ConditionalConstructor.forward(x, yt, t).

    x      : any shape with in_seq*in_feats elements (flattened like .view(-1))
    yt     : 1-D array of length M
    t      : unused (kept to mirror the PyTorch signature)
    weight : ignored -- the reference forward discards self.proj(x), so the
             Linear projection is dead compute and is intentionally not run.
    bias   : ignored (same reason as weight)
    keep_lane_dense : if True, return the lane-dense (1, N+M) row slab instead
             of the torch-shaped (N+M, 1) column (preferred when the consumer
             is another TPU kernel).
    Returns: (N + M, 1) array (or (1, N + M) if keep_lane_dense), N = x.size
    """
    del t, weight, bias  # none of these influence the returned value

    n_x = int(x.size)
    n_yt = int(yt.shape[0])
    n_total = n_x + n_yt

    # torch.cat type-promotes; mirror that instead of silently casting to x.dtype.
    out_dtype = jnp.result_type(x.dtype, yt.dtype)

    x_row = x.reshape(1, n_x)       # x is read exactly once, as a row slab
    yt_row = yt.reshape(1, n_yt)

    bytes_accessed = (
        x_row.size * x_row.dtype.itemsize
        + yt_row.size * yt_row.dtype.itemsize
        + n_total * jnp.dtype(out_dtype).itemsize
    )

    cat_row = pl.pallas_call(
        _concat_kernel,
        out_shape=jax.ShapeDtypeStruct((1, n_total), out_dtype),
        # No grid, no index_maps: single invocation, whole arrays in VMEM.
        in_specs=[
            pl.BlockSpec(memory_space=pltpu.MemorySpace.VMEM),
            pl.BlockSpec(memory_space=pltpu.MemorySpace.VMEM),
        ],
        out_specs=pl.BlockSpec(memory_space=pltpu.MemorySpace.VMEM),
        cost_estimate=pl.CostEstimate(
            flops=0, transcendentals=0, bytes_accessed=bytes_accessed),
    )(x_row, yt_row)

    if keep_lane_dense:
        return cat_row
    # Layout plumbing only; matches torch.cat([x.view(-1).unsqueeze(-1),
    # yt.unsqueeze(-1)], dim=0).
    return cat_row.reshape(n_total, 1)


if __name__ == "__main__":
    # Small shapes consistent with the module: in_seq=8, in_feats=4, out_seq=16
    in_seq, in_feats, out_seq = 8, 4, 16
    n_x = in_seq * in_feats            # 32
    n_yt = out_seq                     # yt: 1-D, here of length 16

    key = jax.random.PRNGKey(0)
    kx, ky, kw, kb = jax.random.split(key, 4)
    x = jax.random.normal(kx, (in_seq, in_feats), dtype=jnp.float32)
    yt = jax.random.normal(ky, (n_yt,), dtype=jnp.float32)

    # Synthetic nn.Linear(in_seq*in_feats, out_seq) parameters.  They exist on
    # the module but do not affect its forward output, so the kernel ignores
    # them (dead-compute elimination per the perf review).
    weight = 0.1 * jax.random.normal(kw, (out_seq, n_x), dtype=jnp.float32)
    bias = 0.1 * jax.random.normal(kb, (out_seq,), dtype=jnp.float32)

    out = conditional_constructor_forward(x, yt, t=0, weight=weight, bias=bias)
    out = jax.block_until_ready(out)

    # Pure-JAX reference of the returned value.
    ref = jnp.concatenate([x.reshape(-1, 1), yt.reshape(-1, 1)], axis=0)
    assert out.shape == (n_x + n_yt, 1), out.shape
    assert out.dtype == ref.dtype, out.dtype
    assert jnp.allclose(out, ref), "mismatch vs reference"

    print("KERNEL_OK")
</pallas_src>

<mosaic_0001>
module attributes {stable_mosaic.version = 11 : i64} {
  func.func @_concat_kernel(%arg0: memref<1x32xf32, #tpu.memory_space<vmem>>, %arg1: memref<1x16xf32, #tpu.memory_space<vmem>>, %arg2: memref<1x48xf32, #tpu.memory_space<vmem>>) attributes {dimension_semantics = [], scalar_prefetch = 0 : i64, scratch_operands = 0 : i64, tpu.core_type = #tpu.core_type<tc>} {
    %c0 = arith.constant 0 : index
    %c0_0 = arith.constant 0 : index
    %0 = vector.load %arg0[%c0, %c0_0] : memref<1x32xf32, #tpu.memory_space<vmem>>, vector<1x32xf32>
    %c0_1 = arith.constant 0 : index
    %c0_2 = arith.constant 0 : index
    %1 = vector.load %arg1[%c0_1, %c0_2] : memref<1x16xf32, #tpu.memory_space<vmem>>, vector<1x16xf32>
    %2 = tpu.concatenate %0, %1 in 1 : vector<1x32xf32>, vector<1x16xf32> -> vector<1x48xf32>
    %c0_3 = arith.constant 0 : index
    %c0_4 = arith.constant 0 : index
    %3 = vector.load %arg2[%c0_3, %c0_4] : memref<1x48xf32, #tpu.memory_space<vmem>>, vector<1x48xf32>
    tpu.vector_store %arg2[%c0_3, %c0_4], %2 {strides = array<i32>} : memref<1x48xf32, #tpu.memory_space<vmem>>, vector<1x48xf32>,
    return
  }
}

</mosaic_0001>

<bundles_post_ra>
// kernel: tpu_custom_call.1
= control target key start
LH: loop header
LB: loop body
LE: loop exit
PB: predicated region body
PF: predicated region fallthrough
CT: control target
= control target key end

     0   :  { %7 = vsyncpa [#allocation3], 0  ;;  %s128_s0 = inlined_call_operand.hbm [shape: f32[1,32], index: 0, kind: input, shape index: {}]   ;;  %s129_s1 = inlined_call_operand.vmem [shape: f32[1,16], index: 1, kind: input, shape index: {}]   ;;  %s130_s2 = inlined_call_operand.hbm [shape: f32[1,48], index: 2, kind: output, shape index: {}]  }
   0x1   :  { %8 = vsyncpa [#allocation4], 0  ;;  %s101_s9 = smov [#allocation2]  }
   0x2   :  { %s15_s10 = sshll.u32 %s101_s9, 4  ;;  %s16_s10 = int_to_ptr.vmem [resolvable:$true] %s15_s10 }
   0x3   :  { %s65_s11 = scalar_lea.vmem %s16_s10, 16  ;;  %s69_s12 = scalar_lea.vmem %s16_s10, 32 }
   0x4   :  { %p66_p0 = scmp.ne.s32.totalorder %s16_s10, %s65_s11  ;;  %p70_p1 = scmp.lt.s32.totalorder %s16_s10, %s16_s10 }
   0x5   :  { %p71_p2 = scmp.lt.s32.totalorder %s69_s12, %s65_s11 }
   0x7   :  { %p72_p3 = por %p71_p2, %p70_p1 }
   0x9   :  { %p73_p4 = pnand %p72_p3, %p66_p0 }
   0xb   :  { %76 = shalt.err (!%p73_p4)
}
   0xc   :  { %18 = dma.hbm_to_vmem [thread:$0]  %s128_s0, 16, %s16_s10, [#allocation3]  }
   0xd   :  { %97 = dma.done.wait [#allocation3], 16  }
   0xe   :  { %98 = vsyncadd [#allocation3], 4294967280  ;;  %v53_v0 = vld [vmem:[%s129_s1] ss:$0 sm:$0xff]  ;;  %s102_s17 = smov 32   ;;  %s103_s18 = smov [#allocation5]  }
   0xf   :  { %31 = vrot.lane.b32.xlu0 %v53_v0, %s102_s17  ;;  %s44_s19 = sshll.u32 %s103_s18, 4  ;;  %v24_v1 = vld [vmem:[#allocation2] sm:$0x1]  ;;  %vm34_vm0 = vcmask 261120   ;;  %vm36_vm1 = vcmask 385024   ;;  %s45_s19 = int_to_ptr.vmem [resolvable:$true] %s44_s19 }
  0x10   :  { %s77_s20 = scalar_lea.vmem %s45_s19, 16  ;;  %s81_s0 = scalar_lea.vmem %s45_s19, 32 }
  0x11   :  { %p78_p5 = scmp.ne.s32.totalorder %s45_s19, %s77_s20  ;;  %p82_p6 = scmp.lt.s32.totalorder %s45_s19, %s45_s19 }
  0x12   :  { %p83_p7 = scmp.lt.s32.totalorder %s81_s0, %s77_s20 }
  0x14   :  { %p84_p8 = por %p83_p7, %p82_p6 }
  0x16   :  { %p85_p9 = pnand %p84_p8, %p78_p5 }
  0x81   :  { %v32_v2 = vpop.permute.xlu0 %31 }
  0x82   :  { %v35_v3 = vsel %vm34_vm0, %v24_v1, %v32_v2 }
  0x83   :  { %37 = vst.msk [vmem:[#allocation5] sm:$0x1] %vm36_vm1, %v35_v3 }
  0x84   :  { %88 = shalt.err (!%p85_p9)
}
  0x85   :  { %47 = dma.vmem_to_hbm [thread:$0]  %s45_s19, 16, %s130_s2, [#allocation4]  }
  0x86   :  { %99 = dma.done.wait [#allocation4], 16  }
  0x87   :  { %100 = vsyncadd [#allocation4], 4294967280 }
  0x88   :  { %51 = vsyncpa [#allocation3], 1 }
  0x89   :  { %52 = vsyncpa [#allocation4], 1 }

</bundles_post_ra>
